<compile_context>
chip_gen: v7x
topology: tpu7x:2x2x1
jax: 0.10.0
libtpu: 0.0.40
codegen_flags: <defaults>
</compile_context>

<pallas_src>
import functools

import jax
import jax.numpy as jnp
from jax import lax
from jax.experimental import pallas as pl
from jax.experimental.pallas import tpu as pltpu

F_PAD = 128        # lane-dense padded hidden width (one MXU tile)
DEFAULT_TB = 1024  # batch rows per grid step (>=85% HBM roofline regime; tiny VMEM)


def _d_net_gauss_kernel(x_ref, w_ref, b_ref, out_ref, *, z_dim):
    # x_ref:   (TB, z_dim) f32     unpadded input rows
    # w_ref:   (3, 128, 128) bf16  layers 1/2 in (in,out) layout, layer 3 in (out,in)
    # b_ref:   (8, 128) f32        row0 = b1, row1 = b2, row2[0] = b3, rest zero
    # out_ref: (1, 1, TB) f32      sigmoid output, one lane per batch row
    b = b_ref[...]

    # lin1 (narrow K = z_dim) -> dropout(p=0.2, eval = identity) -> relu
    x = x_ref[...].astype(jnp.bfloat16)                        # (TB, z_dim)
    w1 = w_ref[0][:z_dim, :]                                   # (z_dim, 128)
    h1 = jnp.dot(x, w1, preferred_element_type=jnp.float32) + b[0:1, :]
    h1 = jnp.maximum(h1, 0.0).astype(jnp.bfloat16)             # (TB, 128)

    # lin2 -> dropout(p=0.2, eval = identity) -> relu
    h2 = jnp.dot(h1, w_ref[1], preferred_element_type=jnp.float32) + b[1:2, :]
    h2 = jnp.maximum(h2, 0.0).astype(jnp.bfloat16)             # (TB, 128)

    # lin3 -> sigmoid, emitted directly as a lane-dense (1, TB) row.
    # w3 is stored in (out, in) layout so the result needs no relayout: this is a
    # trans_b matmul contracting over h2's lane dim (padded lanes of h2 are exact 0).
    w3_row = w_ref[2][:1, :]                                   # (1, 128)
    z = lax.dot_general(w3_row, h2, (((1,), (1,)), ((), ())),
                        preferred_element_type=jnp.float32)    # (1, TB)
    z = z + b[2:3, :1]                                         # scalar bias broadcast
    sig = pl.reciprocal(1.0 + jnp.exp(-z), approx=True)        # sigmoid via EUP
    out_ref[0] = sig


def d_net_gauss_forward(x, params, *, block_b=DEFAULT_TB):
    """x: (B, z_dim) float32. Returns (B, 1) float32 = sigmoid(lin3(relu(lin2(relu(lin1(x))))))."""
    B, z_dim = x.shape
    w_packed = params["w_packed"]   # (3, 128, 128) bf16
    b_packed = params["b_packed"]   # (8, 128) f32

    block_b = min(block_b, B)       # single grid step whenever B <= block_b
    nb = pl.cdiv(B, block_b)

    kernel = functools.partial(_d_net_gauss_kernel, z_dim=z_dim)

    flops = 2 * B * (z_dim * F_PAD + F_PAD * F_PAD + F_PAD)
    transcendentals = 2 * B                                  # exp + approx reciprocal
    bytes_accessed = (B * z_dim * 4                          # x (unpadded)
                      + 3 * F_PAD * F_PAD * 2                # bf16 weights
                      + 8 * F_PAD * 4                        # biases
                      + nb * block_b * 4)                    # narrow output

    out = pl.pallas_call(
        kernel,
        out_shape=jax.ShapeDtypeStruct((nb, 1, block_b), jnp.float32),
        grid_spec=pltpu.PrefetchScalarGridSpec(
            num_scalar_prefetch=0,
            grid=(nb,),
            in_specs=[
                pl.BlockSpec((block_b, z_dim), lambda i: (i, 0)),      # x: tiled over batch
                pl.BlockSpec((3, F_PAD, F_PAD), lambda i: (0, 0, 0)),  # weights: resident
                pl.BlockSpec((8, F_PAD), lambda i: (0, 0)),            # biases: resident
            ],
            out_specs=pl.BlockSpec((1, 1, block_b), lambda i: (i, 0, 0)),
        ),
        compiler_params=pltpu.CompilerParams(
            # Megacore-shard the batch axis only when there are >= 2 grid steps;
            # with a single block the split would just add per-step overhead.
            dimension_semantics=("parallel",) if nb > 1 else ("arbitrary",),
        ),
        cost_estimate=pl.CostEstimate(
            flops=flops,
            transcendentals=transcendentals,
            bytes_accessed=bytes_accessed,
        ),
    )(x, w_packed, b_packed)

    # Garbage entries from a partial last tile sit at the tail -> sliced off here.
    return out.reshape(-1)[:B].reshape(B, 1)


def init_params(key, z_dim, N):
    """PyTorch nn.Linear-style init U(-1/sqrt(fan_in), 1/sqrt(fan_in)).
    Layers 1/2 stored (in, out); layer 3 stored (out, in) = PyTorch native layout so the
    kernel can emit a lane-dense (1, TB) output row.  All zero-padded to 128x128 and
    stacked into one bf16 array; biases packed into one (8,128) f32 array."""
    ks = jax.random.split(key, 6)

    def linear(kw, kb, fan_in, fan_out):
        bound = 1.0 / jnp.sqrt(float(fan_in))
        w = jax.random.uniform(kw, (fan_in, fan_out), jnp.float32, -bound, bound)
        b = jax.random.uniform(kb, (fan_out,), jnp.float32, -bound, bound)
        return w, b

    w1, b1 = linear(ks[0], ks[1], z_dim, N)
    w2, b2 = linear(ks[2], ks[3], N, N)
    w3, b3 = linear(ks[4], ks[5], N, 1)

    def pad_to(a, shape):
        out = jnp.zeros(shape, jnp.float32)
        return out.at[tuple(slice(0, s) for s in a.shape)].set(a)

    w_packed = jnp.stack([
        pad_to(w1, (F_PAD, F_PAD)),        # (in, out)
        pad_to(w2, (F_PAD, F_PAD)),        # (in, out)
        pad_to(w3.T, (F_PAD, F_PAD)),      # layer 3 stored (out, in)
    ]).astype(jnp.bfloat16)

    b_packed = (jnp.zeros((8, F_PAD), jnp.float32)
                .at[0, :N].set(b1)
                .at[1, :N].set(b2)
                .at[2, 0].set(b3[0]))

    return {
        "w_packed": w_packed,
        "b_packed": b_packed,
        "raw": {"w1": w1, "b1": b1, "w2": w2, "b2": b2, "w3": w3, "b3": b3},
    }


def reference_forward(x, params):
    """Pure-JAX eval-mode reference mirroring the kernel's bf16-operand / f32-accum path
    (exact sigmoid, so it also checks the approx-reciprocal error)."""
    raw = params["raw"]
    w1 = raw["w1"].astype(jnp.bfloat16)
    w2 = raw["w2"].astype(jnp.bfloat16)
    w3 = raw["w3"].astype(jnp.bfloat16)
    h1 = jnp.maximum(
        jnp.dot(x.astype(jnp.bfloat16), w1, preferred_element_type=jnp.float32) + raw["b1"], 0.0)
    h2 = jnp.maximum(
        jnp.dot(h1.astype(jnp.bfloat16), w2, preferred_element_type=jnp.float32) + raw["b2"], 0.0)
    z = jnp.dot(h2.astype(jnp.bfloat16), w3, preferred_element_type=jnp.float32) + raw["b3"]
    return 1.0 / (1.0 + jnp.exp(-z))


if __name__ == "__main__":
    # Small shapes consistent with D_net_gauss: batch=256, z_dim=8, N=64.
    B, z_dim, N = 256, 8, 64

    key = jax.random.PRNGKey(0)
    k_x, k_p = jax.random.split(key)
    x = jax.random.normal(k_x, (B, z_dim), jnp.float32)
    params = init_params(k_p, z_dim, N)

    y = d_net_gauss_forward(x, params)
    jax.block_until_ready(y)

    y_ref = reference_forward(x, params)
    assert y.shape == (B, 1)
    assert jnp.allclose(y, y_ref, atol=2e-3, rtol=2e-3), float(jnp.max(jnp.abs(y - y_ref)))

    print("KERNEL_OK")
</pallas_src>

<mosaic_0001>
module attributes {stable_mosaic.version = 11 : i64} {
  func.func @_d_net_gauss_kernel(%arg0: i32, %arg1: memref<256x8xf32, #tpu.memory_space<vmem>>, %arg2: memref<3x128x128xbf16, #tpu.memory_space<vmem>>, %arg3: memref<8x128xf32, #tpu.memory_space<vmem>>, %arg4: memref<1x1x256xf32, #tpu.memory_space<vmem>>) attributes {dimension_semantics = [#tpu.dimension_semantics<arbitrary>], iteration_bounds = array<i64: 1>, scalar_prefetch = 0 : i64, scratch_operands = 0 : i64, tpu.core_type = #tpu.core_type<tc>, window_params = [{transform_indices = @transform_0, window_bounds = array<i64: 256, 8>}, {pipeline_mode = #tpu.pipeline_mode<synchronous>, transform_indices = @transform_1, window_bounds = array<i64: 3, 128, 128>}, {pipeline_mode = #tpu.pipeline_mode<synchronous>, transform_indices = @transform_2, window_bounds = array<i64: 8, 128>}, {transform_indices = @transform_3, window_bounds = array<i64: 1, 1, 256>}]} {
    %c0 = arith.constant 0 : index
    %c0_0 = arith.constant 0 : index
    %0 = vector.load %arg3[%c0, %c0_0] : memref<8x128xf32, #tpu.memory_space<vmem>>, vector<8x128xf32>
    %c0_1 = arith.constant 0 : index
    %c0_2 = arith.constant 0 : index
    %1 = vector.load %arg1[%c0_1, %c0_2] : memref<256x8xf32, #tpu.memory_space<vmem>>, vector<256x8xf32>
    %2 = arith.truncf %1 : vector<256x8xf32> to vector<256x8xbf16>
    %c0_3 = arith.constant 0 : index
    %c0_4 = arith.constant 0 : index
    %c0_5 = arith.constant 0 : index
    %3 = vector.load %arg2[%c0_3, %c0_4, %c0_5] : memref<3x128x128xbf16, #tpu.memory_space<vmem>>, vector<1x128x128xbf16>
    %4 = vector.shape_cast %3 : vector<1x128x128xbf16> to vector<128x128xbf16>
    %5 = vector.extract_strided_slice %4 {offsets = [0, 0], sizes = [8, 128], strides = [1, 1]} : vector<128x128xbf16> to vector<8x128xbf16>
    %cst = arith.constant dense<0.000000e+00> : vector<256x128xf32>
    %6 = tpu.matmul %2, %5, %cst {dimension_numbers = #tpu.dot_dimension_numbers<[1], [0], [0], [1], [0, 0, 1, 1], [], []>} : vector<256x8xbf16>, vector<8x128xbf16>, vector<256x128xf32> -> vector<256x128xf32>
    %7 = vector.extract_strided_slice %0 {offsets = [0, 0], sizes = [1, 128], strides = [1, 1]} : vector<8x128xf32> to vector<1x128xf32>
    %8 = vector.broadcast %7 : vector<1x128xf32> to vector<256x128xf32>
    %9 = arith.addf %6, %8 : vector<256x128xf32>
    %cst_6 = arith.constant 0.000000e+00 : f32
    %10 = vector.broadcast %cst_6 : f32 to vector<256x128xf32>
    %11 = arith.maximumf %9, %10 : vector<256x128xf32>
    %12 = arith.truncf %11 : vector<256x128xf32> to vector<256x128xbf16>
    %c1 = arith.constant 1 : index
    %c0_7 = arith.constant 0 : index
    %c0_8 = arith.constant 0 : index
    %13 = vector.load %arg2[%c1, %c0_7, %c0_8] : memref<3x128x128xbf16, #tpu.memory_space<vmem>>, vector<1x128x128xbf16>
    %14 = vector.shape_cast %13 : vector<1x128x128xbf16> to vector<128x128xbf16>
    %cst_9 = arith.constant dense<0.000000e+00> : vector<256x128xf32>
    %15 = tpu.matmul %12, %14, %cst_9 {dimension_numbers = #tpu.dot_dimension_numbers<[1], [0], [0], [1], [0, 0, 1, 1], [], []>} : vector<256x128xbf16>, vector<128x128xbf16>, vector<256x128xf32> -> vector<256x128xf32>
    %16 = vector.extract_strided_slice %0 {offsets = [1, 0], sizes = [1, 128], strides = [1, 1]} : vector<8x128xf32> to vector<1x128xf32>
    %17 = vector.broadcast %16 : vector<1x128xf32> to vector<256x128xf32>
    %18 = arith.addf %15, %17 : vector<256x128xf32>
    %cst_10 = arith.constant 0.000000e+00 : f32
    %19 = vector.broadcast %cst_10 : f32 to vector<256x128xf32>
    %20 = arith.maximumf %18, %19 : vector<256x128xf32>
    %21 = arith.truncf %20 : vector<256x128xf32> to vector<256x128xbf16>
    %c2 = arith.constant 2 : index
    %c0_11 = arith.constant 0 : index
    %c0_12 = arith.constant 0 : index
    %22 = vector.load %arg2[%c2, %c0_11, %c0_12] : memref<3x128x128xbf16, #tpu.memory_space<vmem>>, vector<1x128x128xbf16>
    %23 = vector.shape_cast %22 : vector<1x128x128xbf16> to vector<128x128xbf16>
    %24 = vector.extract_strided_slice %23 {offsets = [0, 0], sizes = [1, 128], strides = [1, 1]} : vector<128x128xbf16> to vector<1x128xbf16>
    %cst_13 = arith.constant dense<0.000000e+00> : vector<1x256xf32>
    %25 = tpu.matmul %24, %21, %cst_13 {dimension_numbers = #tpu.dot_dimension_numbers<[1], [1], [0], [0], [0, 0, 1, 0], [], []>} : vector<1x128xbf16>, vector<256x128xbf16>, vector<1x256xf32> -> vector<1x256xf32>
    %26 = vector.extract_strided_slice %0 {offsets = [2, 0], sizes = [1, 1], strides = [1, 1]} : vector<8x128xf32> to vector<1x1xf32>
    %27 = vector.broadcast %26 : vector<1x1xf32> to vector<1x256xf32>
    %28 = arith.addf %25, %27 : vector<1x256xf32>
    %cst_14 = arith.constant 0.000000e+00 : f32
    %29 = vector.broadcast %cst_14 : f32 to vector<1x256xf32>
    %30 = arith.subf %29, %28 : vector<1x256xf32>
    %31 = math.exp %30 : vector<1x256xf32>
    %cst_15 = arith.constant 1.000000e+00 : f32
    %32 = vector.broadcast %cst_15 : f32 to vector<1x256xf32>
    %33 = arith.addf %32, %31 : vector<1x256xf32>
    %34 = tpu.reciprocal %33 {approx = true} : vector<1x256xf32> -> vector<1x256xf32>
    %c0_16 = arith.constant 0 : index
    %c0_17 = arith.constant 0 : index
    %c0_18 = arith.constant 0 : index
    %35 = vector.load %arg4[%c0_16, %c0_17, %c0_18] : memref<1x1x256xf32, #tpu.memory_space<vmem>>, vector<1x1x256xf32>
    %36 = vector.shape_cast %35 : vector<1x1x256xf32> to vector<1x256xf32>
    %37 = vector.shape_cast %34 : vector<1x256xf32> to vector<1x1x256xf32>
    tpu.vector_store %arg4[%c0_16, %c0_17, %c0_18], %37 {strides = array<i32>} : memref<1x1x256xf32, #tpu.memory_space<vmem>>, vector<1x1x256xf32>,
    return
  }
  func.func @transform_0(%arg0: i32) -> (i32, i32) {
    %c0_i32 = arith.constant 0 : i32
    %c0_i32_0 = arith.constant 0 : i32
    return %arg0, %c0_i32 : i32, i32
  }
  func.func @transform_1(%arg0: i32) -> (i32, i32, i32) {
    %c0_i32 = arith.constant 0 : i32
    %c0_i32_0 = arith.constant 0 : i32
    %c0_i32_1 = arith.constant 0 : i32
    %c0_i32_2 = arith.constant 0 : i32
    return %c0_i32, %c0_i32_0, %c0_i32_1 : i32, i32, i32
  }
  func.func @transform_2(%arg0: i32) -> (i32, i32) {
    %c0_i32 = arith.constant 0 : i32
    %c0_i32_0 = arith.constant 0 : i32
    %c0_i32_1 = arith.constant 0 : i32
    return %c0_i32, %c0_i32_0 : i32, i32
  }
  func.func @transform_3(%arg0: i32) -> (i32, i32, i32) {
    %c0_i32 = arith.constant 0 : i32
    %c0_i32_0 = arith.constant 0 : i32
    %c0_i32_1 = arith.constant 0 : i32
    return %arg0, %c0_i32, %c0_i32_0 : i32, i32, i32
  }
}

</mosaic_0001>

<bundles_post_ra>
// kernel: tpu_custom_call.1
= control target key start
LH: loop header
LB: loop body
LE: loop exit
PB: predicated region body
PF: predicated region fallthrough
CT: control target
= control target key end

     0   :  { %vm119_vm0 = vcmask 1043456   ;;  %vm70_vm1 = vcmask 64512   ;;  %s1221_s0 = inlined_call_operand.vmem [shape: f32[256,8], index: 0, kind: input, shape index: {}]   ;;  %s1222_s1 = inlined_call_operand.vmem [shape: bf16[3,128,128], index: 1, kind: input, shape index: {}]   ;;  %s1223_s2 = inlined_call_operand.vmem [shape: f32[8,128], index: 2, kind: input, shape index: {}]   ;;  %s1224_s3 = inlined_call_operand.hbm [shape: f32[1,1,256], index: 3, kind: output, shape index: {}]  }
   0x1   :  { %v65_v0 = vld [vmem:[%s1222_s1] sm:$0xf]  ;;  %v18_v2 = vld [vmem:[%s1221_s0 + $0x8] sm:$0xff]  ;;  %v19_v5 = vld [vmem:[%s1221_s0 + $0x10] sm:$0xff] }
   0x2   :  { %v17_v1 = vld [vmem:[%s1221_s0] sm:$0xff]  ;;  %888 = vmatprep.subr.msk.bf16.mxu0 %vm119_vm0, %v65_v0  ;;  %v121_v3 = vsel %vm119_vm0, %v65_v0, 0  ;;  %v20_v6 = vld [vmem:[%s1221_s0 + $0x18] sm:$0xff]  ;;  %v22_v9 = vld [vmem:[%s1221_s0 + $0x28] sm:$0xff] }
   0x3   :  { %v49_v4 = vpack.c.bf16 %v18_v2, %v17_v1  ;;  %v21_v7 = vld [vmem:[%s1221_s0 + $0x20] sm:$0xff]  ;;  %807 = vmatpush3.bf16.msra.mxu0 %v121_v3  ;;  %v50_v8 = vpack.c.bf16 %v20_v6, %v19_v5  ;;  %v23_v11 = vld [vmem:[%s1221_s0 + $0x30] sm:$0xff]  ;;  %v24_v12 = vld [vmem:[%s1221_s0 + $0x38] sm:$0xff] }
   0x4   :  { %v51_v10 = vpack.c.bf16 %v22_v9, %v21_v7  ;;  %v25_v13 = vld [vmem:[%s1221_s0 + $0x40] sm:$0xff]  ;;  %v26_v14 = vld [vmem:[%s1221_s0 + $0x48] sm:$0xff]  ;;  %v52_v15 = vpack.c.bf16 %v24_v12, %v23_v11  ;;  %v27_v18 = vld [vmem:[%s1221_s0 + $0x50] sm:$0xff] }
   0x5   :  { %808 = vmatprep.mubr.msk.bf16.mxu0 %vm70_vm1, %v49_v4  ;;  %v53_v16 = vpack.c.bf16 %v26_v14, %v25_v13  ;;  %v893_v17 = vld [vmem:[%s1222_s1 + $0x40] sm:$0xff]   ;;  %v28_v19 = vld [vmem:[%s1221_s0 + $0x58] sm:$0xff]  ;;  %v894_v20 = vld [vmem:[%s1222_s1 + $0x48] sm:$0xff]  }
   0x6   :  { %809 = vmatmul.mubr.msk.bf16.vlgmr.msra.gmra.mrb[0].mxu0 %vm70_vm1, %v50_v8  ;;  %v29_v21 = vld [vmem:[%s1221_s0 + $0x60] sm:$0xff]  ;;  %840 = vmatprep.subr.bf16.mxu1 %v893_v17  ;;  %v30_v22 = vld [vmem:[%s1221_s0 + $0x68] sm:$0xff]  ;;  %v895_v23 = vld [vmem:[%s1222_s1 + $0x50] sm:$0xff]   ;;  %v54_v24 = vpack.c.bf16 %v28_v19, %v27_v18 }
   0x7   :  { %812 = vmatprep.mubr.msk.bf16.mxu0 %vm70_vm1, %v51_v10  ;;  %841 = vmatpush3.bf16.msra.mxu1 %v893_v17  ;;  %v55_v25 = vpack.c.bf16 %v30_v22, %v29_v21 }
   0x8   :  { %842 = vmatprep.subr.bf16.mxu1 %v894_v20 }
   0xb   :  { %843 = vmatpush3.bf16.msra.mxu1 %v894_v20 }
   0xe   :  { %813 = vmatmul.mubr.msk.bf16.gmra.mrb[4].mxu0 %vm70_vm1, %v52_v15 }
   0xf   :  { %816 = vmatprep.mubr.msk.bf16.mxu0 %vm70_vm1, %v53_v16 }
  0x10   :  { %8 = vsyncpa [#allocation3], 0  ;;  %844 = vmatprep.subr.bf16.mxu1 %v895_v23  ;;  %v896_v26 = vld [vmem:[%s1222_s1 + $0x58] sm:$0xff]   ;;  %v31_v27 = vld [vmem:[%s1221_s0 + $0x70] sm:$0xff]  ;;  %v66_v58 = vlaneseq }
  0x11   :  { %v32_v28 = vld [vmem:[%s1221_s0 + $0x78] sm:$0xff]  ;;  %845 = vmatpush3.bf16.msra.mxu1 %v895_v23  ;;  %v33_v29 = vld [vmem:[%s1221_s0 + $0x80] sm:$0xff]  ;;  %v34_v30 = vld [vmem:[%s1221_s0 + $0x88] sm:$0xff] }
  0x12   :  { %846 = vmatprep.subr.bf16.mxu1 %v896_v26  ;;  %v897_v31 = vld [vmem:[%s1222_s1 + $0x60] sm:$0xff]   ;;  %v56_v32 = vpack.c.bf16 %v32_v28, %v31_v27  ;;  %v57_v33 = vpack.c.bf16 %v34_v30, %v33_v29  ;;  %v898_v34 = vld [vmem:[%s1222_s1 + $0x68] sm:$0xff]   ;;  %v35_v35 = vld [vmem:[%s1221_s0 + $0x90] sm:$0xff]  ;;  %v1096_v59 = vshrl.u32 %v66_v58, 7  ;;  %vm689_vm2 = vcmp.lt.s32.totalorder %v66_v58, 256 }
  0x13   :  { %v36_v36 = vld [vmem:[%s1221_s0 + $0x98] sm:$0xff]  ;;  %v37_v37 = vld [vmem:[%s1221_s0 + $0xa0] sm:$0xff]  ;;  %v38_v38 = vld [vmem:[%s1221_s0 + $0xa8] sm:$0xff] }
  0x14   :  { %v58_v39 = vpack.c.bf16 %v36_v36, %v35_v35  ;;  %v59_v40 = vpack.c.bf16 %v38_v38, %v37_v37  ;;  %v39_v41 = vld [vmem:[%s1221_s0 + $0xb0] sm:$0xff]  ;;  %v40_v42 = vld [vmem:[%s1221_s0 + $0xb8] sm:$0xff]  ;;  %v41_v43 = vld [vmem:[%s1221_s0 + $0xc0] sm:$0xff]  ;;  %v68_v60 = vsub.s32 0, %v1096_v59 }
  0x15   :  { %847 = vmatpush3.bf16.msra.mxu1 %v896_v26  ;;  %v42_v44 = vld [vmem:[%s1221_s0 + $0xc8] sm:$0xff]  ;;  %v60_v45 = vpack.c.bf16 %v40_v42, %v39_v41  ;;  %v43_v47 = vld [vmem:[%s1221_s0 + $0xd0] sm:$0xff]  ;;  %v44_v48 = vld [vmem:[%s1221_s0 + $0xd8] sm:$0xff] }
  0x16   :  { %817 = vmatmul.mubr.msk.bf16.gmra.mrb[8].mxu0 %vm70_vm1, %v54_v24  ;;  %848 = vmatprep.subr.bf16.mxu1 %v897_v31  ;;  %v61_v46 = vpack.c.bf16 %v42_v44, %v41_v43  ;;  %v45_v49 = vld [vmem:[%s1221_s0 + $0xe0] sm:$0xff]  ;;  %v46_v50 = vld [vmem:[%s1221_s0 + $0xe8] sm:$0xff]  ;;  %v62_v51 = vpack.c.bf16 %v44_v48, %v43_v47  ;;  %v47_v53 = vld [vmem:[%s1221_s0 + $0xf0] sm:$0xff] }
  0x17   :  { %820 = vmatprep.mubr.msk.bf16.mxu0 %vm70_vm1, %v55_v25  ;;  %v63_v52 = vpack.c.bf16 %v46_v50, %v45_v49  ;;  %v48_v54 = vld [vmem:[%s1221_s0 + $0xf8] sm:$0xff]  ;;  %v899_v56 = vld [vmem:[%s1222_s1 + $0x70] sm:$0xff]   ;;  %v1102_v61 = vld [vmem:[%s1223_s2] sm:$0xff] }
  0x18   :  { %v64_v55 = vpack.c.bf16 %v48_v54, %v47_v53  ;;  %v900_v57 = vld [vmem:[%s1222_s1 + $0x78] sm:$0xff]   ;;  %v1105_v62 = vrot.slane %v1102_v61, %v68_v60 }
  0x19   :  { %849 = vmatpush3.bf16.msra.mxu1 %v897_v31 }
  0x1a   :  { %850 = vmatprep.subr.bf16.mxu1 %v898_v34 }
  0x1d   :  { %851 = vmatpush3.bf16.msra.mxu1 %v898_v34 }
  0x1e   :  { %821 = vmatmul.mubr.msk.bf16.gmra.mrb[12].mxu0 %vm70_vm1, %v56_v32  ;;  %852 = vmatprep.subr.bf16.mxu1 %v899_v56 }
  0x1f   :  { %824 = vmatprep.mubr.msk.bf16.mxu0 %vm70_vm1, %v57_v33 }
  0x21   :  { %853 = vmatpush3.bf16.msra.mxu1 %v899_v56 }
  0x22   :  { %854 = vmatprep.subr.bf16.mxu1 %v900_v57 }
  0x25   :  { %855 = vmatpush3.bf16.msra.mxu1 %v900_v57 }
  0x26   :  { %825 = vmatmul.mubr.msk.bf16.gmra.mrb[16].mxu0 %vm70_vm1, %v58_v39 }
  0x27   :  { %828 = vmatprep.mubr.msk.bf16.mxu0 %vm70_vm1, %v59_v40 }
  0x2e   :  { %829 = vmatmul.mubr.msk.bf16.gmra.mrb[20].mxu0 %vm70_vm1, %v60_v45 }
  0x2f   :  { %832 = vmatprep.mubr.msk.bf16.mxu0 %vm70_vm1, %v61_v46 }
  0x36   :  { %833 = vmatmul.mubr.msk.bf16.gmra.mrb[24].mxu0 %vm70_vm1, %v62_v51 }
  0x37   :  { %836 = vmatprep.mubr.msk.bf16.mxu0 %vm70_vm1, %v63_v52 }
  0x3e   :  { %837 = vmatmul.mubr.msk.bf16.gmra.mrb[28].mxu0 %vm70_vm1, %v64_v55 }
  0xd9   :  { %v810_v63 = vpop.f32.mrb[0].mxu0 }
  0xda   :  { %v166_v0 = vadd.f32 %v810_v63, %v1105_v62  ;;  %v157_v1 = vpop.f32.mrb[1].mxu0 }
  0xdb   :  { %v158_v2 = vadd.f32 %v157_v1, %v1105_v62  ;;  %v811_v3 = vpop.f32.mrb[2].mxu0 }
  0xdc   :  { %v169_v4 = vadd.f32 %v811_v3, %v1105_v62  ;;  %v160_v5 = vpop.f32.mrb[3].mxu0  ;;  %v286_v7 = vmax.f32 %v166_v0, 0.0 }
  0xdd   :  { %v161_v6 = vadd.f32 %v160_v5, %v1105_v62  ;;  %v284_v9 = vmax.f32 %v158_v2, 0.0 }
  0xde   :  { %v287_v8 = vmax.f32 %v169_v4, 0.0 }
  0xdf   :  { %v285_v10 = vmax.f32 %v161_v6, 0.0 }
  0xe0   :  { %v317_v11 = vpack.c.bf16 %v287_v8, %v286_v7 }
  0xe1   :  { %v814_v12 = vpop.f32.mrb[4].mxu0  ;;  %v316_v13 = vpack.c.bf16 %v285_v10, %v284_v9 }
  0xe2   :  { %v182_v14 = vadd.f32 %v814_v12, %v1105_v62  ;;  %v173_v15 = vpop.f32.mrb[5].mxu0 }
  0xe3   :  { %v174_v16 = vadd.f32 %v173_v15, %v1105_v62  ;;  %v815_v17 = vpop.f32.mrb[6].mxu0  ;;  %856 = vmatprep.mubr.bf16.mxu1 %v316_v13 }
  0xe4   :  { %v185_v18 = vadd.f32 %v815_v17, %v1105_v62  ;;  %v176_v19 = vpop.f32.mrb[7].mxu0  ;;  %857 = vmatmul.mubr.bf16.vlgmr.msra.gmra.mrb[0].mxu1 %v317_v11  ;;  %v290_v21 = vmax.f32 %v182_v14, 0.0 }
  0xe5   :  { %v177_v20 = vadd.f32 %v176_v19, %v1105_v62  ;;  %v288_v23 = vmax.f32 %v174_v16, 0.0 }
  0xe6   :  { %v291_v22 = vmax.f32 %v185_v18, 0.0 }
  0xe7   :  { %v289_v24 = vmax.f32 %v177_v20, 0.0 }
  0xe8   :  { %v319_v25 = vpack.c.bf16 %v291_v22, %v290_v21 }
  0xe9   :  { %v318_v26 = vpack.c.bf16 %v289_v24, %v288_v23  ;;  %v818_v27 = vpop.f32.mrb[8].mxu0 }
  0xea   :  { %v198_v28 = vadd.f32 %v818_v27, %v1105_v62  ;;  %v189_v29 = vpop.f32.mrb[9].mxu0 }
  0xeb   :  { %v190_v30 = vadd.f32 %v189_v29, %v1105_v62  ;;  %v819_v31 = vpop.f32.mrb[10].mxu0  ;;  %860 = vmatprep.mubr.bf16.mxu1 %v318_v26 }
  0xec   :  { %v201_v32 = vadd.f32 %v819_v31, %v1105_v62  ;;  %v192_v33 = vpop.f32.mrb[11].mxu0  ;;  %861 = vmatmul.mubr.bf16.gmra.mrb[4].mxu1 %v319_v25  ;;  %v294_v35 = vmax.f32 %v198_v28, 0.0 }
  0xed   :  { %v193_v34 = vadd.f32 %v192_v33, %v1105_v62  ;;  %v292_v37 = vmax.f32 %v190_v30, 0.0 }
  0xee   :  { %v295_v36 = vmax.f32 %v201_v32, 0.0 }
  0xef   :  { %v293_v38 = vmax.f32 %v193_v34, 0.0 }
  0xf0   :  { %v321_v39 = vpack.c.bf16 %v295_v36, %v294_v35 }
  0xf1   :  { %v320_v40 = vpack.c.bf16 %v293_v38, %v292_v37  ;;  %v822_v41 = vpop.f32.mrb[12].mxu0 }
  0xf2   :  { %v214_v42 = vadd.f32 %v822_v41, %v1105_v62  ;;  %v205_v43 = vpop.f32.mrb[13].mxu0 }
  0xf3   :  { %v206_v44 = vadd.f32 %v205_v43, %v1105_v62  ;;  %v823_v45 = vpop.f32.mrb[14].mxu0  ;;  %864 = vmatprep.mubr.bf16.mxu1 %v320_v40 }
  0xf4   :  { %v217_v46 = vadd.f32 %v823_v45, %v1105_v62  ;;  %v208_v47 = vpop.f32.mrb[15].mxu0  ;;  %865 = vmatmul.mubr.bf16.gmra.mrb[8].mxu1 %v321_v39  ;;  %v298_v49 = vmax.f32 %v214_v42, 0.0 }
  0xf5   :  { %v209_v48 = vadd.f32 %v208_v47, %v1105_v62  ;;  %v296_v51 = vmax.f32 %v206_v44, 0.0 }
  0xf6   :  { %v299_v50 = vmax.f32 %v217_v46, 0.0 }
  0xf7   :  { %v297_v52 = vmax.f32 %v209_v48, 0.0 }
  0xf8   :  { %v323_v53 = vpack.c.bf16 %v299_v50, %v298_v49 }
  0xf9   :  { %v322_v54 = vpack.c.bf16 %v297_v52, %v296_v51  ;;  %v826_v55 = vpop.f32.mrb[16].mxu0  ;;  %v1142_v51 = vld [vmem:[%s1222_s1 + $0x80] sm:$0xf]  ;;  %v933_v52 = vmov 0   ;;  %s935_s1 = smov [#allocation2]  }
  0xfa   :  { %v230_v56 = vadd.f32 %v826_v55, %v1105_v62  ;;  %v221_v57 = vpop.f32.mrb[17].mxu0  ;;  %804 = vmatprep.mubr.bf16.mxu0 %v1142_v51  ;;  %892 = vset.pattern.permute.xlu0 %v933_v52  ;;  %s698_s15 = sshll.u32 %s935_s1, 4  ;;  %s699_s15 = int_to_ptr.vmem [resolvable:$true] %s698_s15 }
  0xfb   :  { %v222_v60 = vadd.f32 %v221_v57, %v1105_v62  ;;  %v827_v63 = vpop.f32.mrb[18].mxu0  ;;  %868 = vmatprep.mubr.bf16.mxu1 %v322_v54  ;;  %614 = vperm.xlu0 %892, %v1102_v61   ;;  %s909_s16 = scalar_lea.vmem %s699_s15, 32  ;;  %p914_p1 = scmp.lt.s32.totalorder %s699_s15, %s699_s15 }
  0xfc   :  { %v233_v0 = vadd.f32 %v827_v63, %v1105_v62  ;;  %v224_v1 = vpop.f32.mrb[19].mxu0  ;;  %869 = vmatmul.mubr.bf16.gmra.mrb[12].mxu1 %v323_v53  ;;  %v302_v3 = vmax.f32 %v230_v56, 0.0  ;;  %v351_v53 = vsub.s32 1, %v1096_v59  ;;  %p910_p0 = scmp.ne.s32.totalorder %s699_s15, %s909_s16  ;;  %p915_p2 = scmp.lt.s32.totalorder %s909_s16, %s909_s16 }
  0xfd   :  { %v225_v2 = vadd.f32 %v224_v1, %v1105_v62  ;;  %v300_v5 = vmax.f32 %v222_v60, 0.0 }
  0xfe   :  { %v303_v4 = vmax.f32 %v233_v0, 0.0  ;;  %p916_p3 = por %p915_p2, %p914_p1 }
  0xff   :  { %v301_v6 = vmax.f32 %v225_v2, 0.0 }
 0x100   :  { %v325_v7 = vpack.c.bf16 %v303_v4, %v302_v3  ;;  %p917_p4 = pnand %p916_p3, %p910_p0 }
 0x101   :  { %v324_v8 = vpack.c.bf16 %v301_v6, %v300_v5  ;;  %v830_v9 = vpop.f32.mrb[20].mxu0 }
 0x102   :  { %v246_v10 = vadd.f32 %v830_v9, %v1105_v62  ;;  %v237_v11 = vpop.f32.mrb[21].mxu0 }
 0x103   :  { %v238_v12 = vadd.f32 %v237_v11, %v1105_v62  ;;  %872 = vmatprep.mubr.bf16.mxu1 %v324_v8  ;;  %v831_v13 = vpop.f32.mrb[22].mxu0 }
 0x104   :  { %v306_v14 = vmax.f32 %v246_v10, 0.0  ;;  %v249_v15 = vadd.f32 %v831_v13, %v1105_v62  ;;  %873 = vmatmul.mubr.bf16.gmra.mrb[16].mxu1 %v325_v7  ;;  %v240_v16 = vpop.f32.mrb[23].mxu0 }
 0x105   :  { %v304_v17 = vmax.f32 %v238_v12, 0.0  ;;  %v241_v18 = vadd.f32 %v240_v16, %v1105_v62 }
 0x106   :  { %v307_v19 = vmax.f32 %v249_v15, 0.0 }
 0x107   :  { %v305_v20 = vmax.f32 %v241_v18, 0.0 }
 0x108   :  { %v327_v21 = vpack.c.bf16 %v307_v19, %v306_v14 }
 0x109   :  { %v326_v22 = vpack.c.bf16 %v305_v20, %v304_v17  ;;  %v834_v23 = vpop.f32.mrb[24].mxu0 }
 0x10a   :  { %v262_v24 = vadd.f32 %v834_v23, %v1105_v62  ;;  %v253_v25 = vpop.f32.mrb[25].mxu0 }
 0x10b   :  { %876 = vmatprep.mubr.bf16.mxu1 %v326_v22  ;;  %v254_v26 = vadd.f32 %v253_v25, %v1105_v62  ;;  %v835_v27 = vpop.f32.mrb[26].mxu0 }
 0x10c   :  { %877 = vmatmul.mubr.bf16.gmra.mrb[20].mxu1 %v327_v21  ;;  %v310_v28 = vmax.f32 %v262_v24, 0.0  ;;  %v265_v29 = vadd.f32 %v835_v27, %v1105_v62  ;;  %v256_v30 = vpop.f32.mrb[27].mxu0 }
 0x10d   :  { %v308_v31 = vmax.f32 %v254_v26, 0.0  ;;  %v257_v32 = vadd.f32 %v256_v30, %v1105_v62 }
 0x10e   :  { %v311_v33 = vmax.f32 %v265_v29, 0.0 }
 0x10f   :  { %v309_v34 = vmax.f32 %v257_v32, 0.0 }
 0x110   :  { %v329_v35 = vpack.c.bf16 %v311_v33, %v310_v28 }
 0x111   :  { %v328_v36 = vpack.c.bf16 %v309_v34, %v308_v31  ;;  %v838_v37 = vpop.f32.mrb[28].mxu0 }
 0x112   :  { %v278_v38 = vadd.f32 %v838_v37, %v1105_v62  ;;  %v269_v39 = vpop.f32.mrb[29].mxu0 }
 0x113   :  { %880 = vmatprep.mubr.bf16.mxu1 %v328_v36  ;;  %v270_v40 = vadd.f32 %v269_v39, %v1105_v62  ;;  %v839_v41 = vpop.f32.mrb[30].mxu0 }
 0x114   :  { %881 = vmatmul.mubr.bf16.gmra.mrb[24].mxu1 %v329_v35  ;;  %v314_v42 = vmax.f32 %v278_v38, 0.0  ;;  %v281_v43 = vadd.f32 %v839_v41, %v1105_v62  ;;  %v272_v44 = vpop.f32.mrb[31].mxu0 }
 0x115   :  { %v312_v45 = vmax.f32 %v270_v40, 0.0  ;;  %v273_v46 = vadd.f32 %v272_v44, %v1105_v62  ;;  %v1148_v62 = vrot.slane %v1102_v61, %v351_v53 }
 0x116   :  { %v315_v47 = vmax.f32 %v281_v43, 0.0 }
 0x117   :  { %v313_v48 = vmax.f32 %v273_v46, 0.0 }
 0x118   :  { %v331_v49 = vpack.c.bf16 %v315_v47, %v314_v42 }
 0x119   :  { %v330_v50 = vpack.c.bf16 %v313_v48, %v312_v45 }
 0x11b   :  { %884 = vmatprep.mubr.bf16.mxu1 %v330_v50 }
 0x11c   :  { %885 = vmatmul.mubr.bf16.gmra.mrb[28].mxu1 %v331_v49 }
 0x1b7   :  { %v858_v54 = vpop.f32.mrb[0].mxu1 }
 0x1b8   :  { %v444_v55 = vadd.f32 %v858_v54, %v1148_v62  ;;  %v435_v56 = vpop.f32.mrb[1].mxu1 }
 0x1b9   :  { %v436_v57 = vadd.f32 %v435_v56, %v1148_v62  ;;  %v859_v60 = vpop.f32.mrb[2].mxu1 }
 0x1ba   :  { %v447_v63 = vadd.f32 %v859_v60, %v1148_v62  ;;  %v438_v0 = vpop.f32.mrb[3].mxu1  ;;  %v564_v2 = vmax.f32 %v444_v55, 0.0 }
 0x1bb   :  { %v439_v1 = vadd.f32 %v438_v0, %v1148_v62  ;;  %v562_v4 = vmax.f32 %v436_v57, 0.0 }
 0x1bc   :  { %v565_v3 = vmax.f32 %v447_v63, 0.0 }
 0x1bd   :  { %v563_v5 = vmax.f32 %v439_v1, 0.0 }
 0x1be   :  { %v1154_v6 = vpack.c.bf16 %v565_v3, %v564_v2 }
 0x1bf   :  { %v1156_v61 = vpack.c.bf16 %v563_v5, %v562_v4  ;;  %v862_v7 = vpop.f32.mrb[4].mxu1 }
 0x1c0   :  { %v460_v8 = vadd.f32 %v862_v7, %v1148_v62  ;;  %v451_v9 = vpop.f32.mrb[5].mxu1 }
 0x1c1   :  { %v452_v10 = vadd.f32 %v451_v9, %v1148_v62  ;;  %v863_v11 = vpop.f32.mrb[6].mxu1 }
 0x1c2   :  { %v463_v12 = vadd.f32 %v863_v11, %v1148_v62  ;;  %v454_v13 = vpop.f32.mrb[7].mxu1  ;;  %v568_v15 = vmax.f32 %v460_v8, 0.0 }
 0x1c3   :  { %v455_v14 = vadd.f32 %v454_v13, %v1148_v62  ;;  %v566_v17 = vmax.f32 %v452_v10, 0.0 }
 0x1c4   :  { %v569_v16 = vmax.f32 %v463_v12, 0.0 }
 0x1c5   :  { %v567_v18 = vmax.f32 %v455_v14, 0.0 }
 0x1c6   :  { %v1162_v19 = vpack.c.bf16 %v569_v16, %v568_v15 }
 0x1c7   :  { %v1164_v20 = vpack.c.bf16 %v567_v18, %v566_v17  ;;  %v866_v21 = vpop.f32.mrb[8].mxu1 }
 0x1c8   :  { %v476_v22 = vadd.f32 %v866_v21, %v1148_v62  ;;  %v467_v23 = vpop.f32.mrb[9].mxu1 }
 0x1c9   :  { %v468_v24 = vadd.f32 %v467_v23, %v1148_v62  ;;  %v867_v25 = vpop.f32.mrb[10].mxu1 }
 0x1ca   :  { %v479_v26 = vadd.f32 %v867_v25, %v1148_v62  ;;  %v470_v27 = vpop.f32.mrb[11].mxu1  ;;  %v572_v29 = vmax.f32 %v476_v22, 0.0 }
 0x1cb   :  { %v471_v28 = vadd.f32 %v470_v27, %v1148_v62  ;;  %v570_v31 = vmax.f32 %v468_v24, 0.0 }
 0x1cc   :  { %v573_v30 = vmax.f32 %v479_v26, 0.0 }
 0x1cd   :  { %v571_v32 = vmax.f32 %v471_v28, 0.0 }
 0x1ce   :  { %v1170_v33 = vpack.c.bf16 %v573_v30, %v572_v29 }
 0x1cf   :  { %v1172_v34 = vpack.c.bf16 %v571_v32, %v570_v31  ;;  %v870_v35 = vpop.f32.mrb[12].mxu1 }
 0x1d0   :  { %v492_v36 = vadd.f32 %v870_v35, %v1148_v62  ;;  %v483_v37 = vpop.f32.mrb[13].mxu1 }
 0x1d1   :  { %v484_v38 = vadd.f32 %v483_v37, %v1148_v62  ;;  %v871_v39 = vpop.f32.mrb[14].mxu1 }
 0x1d2   :  { %v495_v40 = vadd.f32 %v871_v39, %v1148_v62  ;;  %v486_v41 = vpop.f32.mrb[15].mxu1  ;;  %v576_v43 = vmax.f32 %v492_v36, 0.0 }
 0x1d3   :  { %v487_v42 = vadd.f32 %v486_v41, %v1148_v62  ;;  %v574_v45 = vmax.f32 %v484_v38, 0.0 }
 0x1d4   :  { %v577_v44 = vmax.f32 %v495_v40, 0.0 }
 0x1d5   :  { %v575_v46 = vmax.f32 %v487_v42, 0.0 }
 0x1d6   :  { %v1178_v47 = vpack.c.bf16 %v577_v44, %v576_v43 }
 0x1d7   :  { %v1180_v48 = vpack.c.bf16 %v575_v46, %v574_v45  ;;  %v874_v49 = vpop.f32.mrb[16].mxu1 }
 0x1d8   :  { %v508_v50 = vadd.f32 %v874_v49, %v1148_v62  ;;  %v499_v52 = vpop.f32.mrb[17].mxu1 }
 0x1d9   :  { %v500_v53 = vadd.f32 %v499_v52, %v1148_v62  ;;  %v875_v54 = vpop.f32.mrb[18].mxu1 }
 0x1da   :  { %v511_v55 = vadd.f32 %v875_v54, %v1148_v62  ;;  %v502_v56 = vpop.f32.mrb[19].mxu1  ;;  %v580_v60 = vmax.f32 %v508_v50, 0.0 }
 0x1db   :  { %v503_v57 = vadd.f32 %v502_v56, %v1148_v62  ;;  %v578_v0 = vmax.f32 %v500_v53, 0.0 }
 0x1dc   :  { %v581_v63 = vmax.f32 %v511_v55, 0.0 }
 0x1dd   :  { %v579_v1 = vmax.f32 %v503_v57, 0.0 }
 0x1de   :  { %v603_v2 = vpack.c.bf16 %v581_v63, %v580_v60 }
 0x1df   :  { %v602_v3 = vpack.c.bf16 %v579_v1, %v578_v0  ;;  %v878_v4 = vpop.f32.mrb[20].mxu1 }
 0x1e0   :  { %v524_v5 = vadd.f32 %v878_v4, %v1148_v62  ;;  %v515_v7 = vpop.f32.mrb[21].mxu1 }
 0x1e1   :  { %v516_v8 = vadd.f32 %v515_v7, %v1148_v62  ;;  %788 = vmatprep.subr.bf16.mxu0 %v602_v3  ;;  %v879_v9 = vpop.f32.mrb[22].mxu1 }
 0x1e2   :  { %v584_v10 = vmax.f32 %v524_v5, 0.0  ;;  %v527_v11 = vadd.f32 %v879_v9, %v1148_v62  ;;  %789 = vmatpush3.bf16.xpose.msra.mxu0 %v1156_v61  ;;  %v518_v12 = vpop.f32.mrb[23].mxu1 }
 0x1e3   :  { %v582_v13 = vmax.f32 %v516_v8, 0.0  ;;  %v519_v14 = vadd.f32 %v518_v12, %v1148_v62  ;;  %790 = vmatprep.subr.bf16.mxu0 %v603_v2 }
 0x1e4   :  { %v585_v15 = vmax.f32 %v527_v11, 0.0 }
 0x1e5   :  { %v583_v16 = vmax.f32 %v519_v14, 0.0 }
 0x1e6   :  { %v605_v17 = vpack.c.bf16 %v585_v15, %v584_v10 }
 0x1e7   :  { %v604_v18 = vpack.c.bf16 %v583_v16, %v582_v13  ;;  %v882_v21 = vpop.f32.mrb[24].mxu1 }
 0x1e8   :  { %v540_v22 = vadd.f32 %v882_v21, %v1148_v62  ;;  %v531_v23 = vpop.f32.mrb[25].mxu1 }
 0x1e9   :  { %v532_v24 = vadd.f32 %v531_v23, %v1148_v62  ;;  %v883_v25 = vpop.f32.mrb[26].mxu1 }
 0x1ea   :  { %791 = vmatpush3.bf16.xpose.msra.mxu0 %v1154_v6  ;;  %v588_v26 = vmax.f32 %v540_v22, 0.0  ;;  %v543_v61 = vadd.f32 %v883_v25, %v1148_v62  ;;  %v534_v27 = vpop.f32.mrb[27].mxu1 }
 0x1eb   :  { %792 = vmatprep.subr.bf16.mxu0 %v604_v18  ;;  %v586_v28 = vmax.f32 %v532_v24, 0.0  ;;  %v535_v29 = vadd.f32 %v534_v27, %v1148_v62 }
 0x1ec   :  { %v589_v30 = vmax.f32 %v543_v61, 0.0 }
 0x1ed   :  { %v587_v31 = vmax.f32 %v535_v29, 0.0 }
 0x1ee   :  { %v607_v32 = vpack.c.bf16 %v589_v30, %v588_v26 }
 0x1ef   :  { %v606_v35 = vpack.c.bf16 %v587_v31, %v586_v28  ;;  %v886_v36 = vpop.f32.mrb[28].mxu1 }
 0x1f0   :  { %v556_v37 = vadd.f32 %v886_v36, %v1148_v62  ;;  %v547_v38 = vpop.f32.mrb[29].mxu1 }
 0x1f1   :  { %v548_v39 = vadd.f32 %v547_v38, %v1148_v62  ;;  %v887_v40 = vpop.f32.mrb[30].mxu1 }
 0x1f2   :  { %793 = vmatpush3.bf16.xpose.msra.mxu0 %v1164_v20  ;;  %v592_v6 = vmax.f32 %v556_v37, 0.0  ;;  %v559_v41 = vadd.f32 %v887_v40, %v1148_v62  ;;  %v550_v42 = vpop.f32.mrb[31].mxu1 }
 0x1f3   :  { %794 = vmatprep.subr.bf16.mxu0 %v605_v17  ;;  %v590_v43 = vmax.f32 %v548_v39, 0.0  ;;  %v551_v44 = vadd.f32 %v550_v42, %v1148_v62  ;;  %v615_v62 = vpop.permute.xlu0 %614 }
 0x1f4   :  { %v593_v45 = vmax.f32 %v559_v41, 0.0  ;;  %v616_v20 = vrot.slane %v615_v62, 2 }
 0x1f5   :  { %v591_v46 = vmax.f32 %v551_v44, 0.0 }
 0x1f6   :  { %v609_v49 = vpack.c.bf16 %v593_v45, %v592_v6 }
 0x1f7   :  { %v608_v50 = vpack.c.bf16 %v591_v46, %v590_v43 }
 0x1fa   :  { %795 = vmatpush3.bf16.xpose.msra.mxu0 %v1162_v19 }
 0x1fb   :  { %796 = vmatprep.subr.bf16.mxu0 %v606_v35 }
 0x202   :  { %797 = vmatpush3.bf16.xpose.msra.mxu0 %v1172_v34 }
 0x203   :  { %798 = vmatprep.subr.bf16.mxu0 %v607_v32 }
 0x20a   :  { %799 = vmatpush3.bf16.xpose.msra.mxu0 %v1170_v33 }
 0x20b   :  { %800 = vmatprep.subr.bf16.mxu0 %v608_v50 }
 0x212   :  { %801 = vmatpush3.bf16.xpose.msra.mxu0 %v1180_v48 }
 0x213   :  { %802 = vmatprep.subr.bf16.mxu0 %v609_v49 }
 0x21a   :  { %803 = vmatpush3.bf16.xpose.msra.mxu0 %v1178_v47 }
 0x221   :  { %805 = vmatmul.mubr.bf16.vlgmr.msra.gmra.mrb[32].mxu0 %v1142_v51  ;;  %v934_v51 = vmov 1966171168  }
 0x222   :  { %v673_v1 = vunpack.c.l.s4 %v934_v51 }
 0x224   :  { %v674_v2 = vunpack.c.0.s8 %v673_v1 }
 0x226   :  { %v677_v4 = vsub.s32 %v674_v2, %v1096_v59 }
 0x2f4   :  { %v652_v52 = vpop.f32.mrb[32].mxu0 }
 0x2f5   :  { %v653_v53 = vadd.f32 %v652_v52, %v616_v20  ;;  %v654_v54 = vpop.f32.mrb[33].mxu0 }
 0x2f6   :  { %v655_v19 = vadd.f32 %v654_v54, %v616_v20  ;;  %v656_v55 = vpop.f32.mrb[34].mxu0 }
 0x2f7   :  { %v659_v56 = vsub.f32 0.0, %v653_v53  ;;  %v657_v34 = vpop.f32.mrb[35].mxu0 }
 0x2f8   :  { %v660_v57 = vsub.f32 0.0, %v655_v19 }
 0x2f9   :  { %v661_v60 = vmul.f32 1.442695, %v659_v56 }
 0x2fa   :  { %v663_v33 = vmul.f32 1.442695, %v660_v57 }
 0x2fb   :  { %901 = vpow2.f32 %v661_v60 }
 0x2fc   :  { %903 = vpow2.f32 %v663_v33 }
 0x305   :  { %v902_v48 = vpop.eup %901 }
 0x306   :  { %v904_v63 = vpop.eup %903  ;;  %v665_v0 = vadd.f32 1.0, %v902_v48 }
 0x307   :  { %v666_v47 = vadd.f32 1.0, %v904_v63 }
 0x308   :  { %905 = vrcp.f32 %v665_v0 }
 0x309   :  { %907 = vrcp.f32 %v666_v47 }
 0x312   :  { %v906_v3 = vpop.eup %905 }
 0x313   :  { %v908_v5 = vpop.eup %907 }
 0x314   :  { %v671_v7 = vcombine.low %v906_v3, %v908_v5 }
 0x316   :  { %v678_v8 = vrot.slane %v671_v7, %v677_v4 }
 0x318   :  { %v685_v9 = vrot.slane %v678_v8, %v677_v4 }
 0x31a   :  { %691 = vst.msk [vmem:[#allocation2] sm:$0x3] %vm689_vm2, %v685_v9 }
 0x31b   :  { %920 = shalt.err (!%p917_p4)
}
 0x31c   :  { %s921_s19 = scalar_lea.hbm %s1224_s3, 32 }
 0x31d   :  { %p922_p5 = scmp.ne.s32.totalorder %s1224_s3, %s921_s19  ;;  %p925_p6 = scmp.lt.u32.totalorder %s921_s19, %s1224_s3 }
 0x31f   :  { %p927_p7 = pnand %p925_p6, %p922_p5 }
 0x321   :  { %930 = shalt.err (!%p927_p7)
}
 0x322   :  { %701 = dma.vmem_to_hbm [thread:$0]  %s699_s15, 32, %s1224_s3, [#allocation3]  }
 0x323   :  { %931 = dma.done.wait [#allocation3], 32  }
 0x324   :  { %932 = vsyncadd [#allocation3], 4294967264 }
 0x325   :  { %705 = vsyncpa [#allocation3], 1 }

</bundles_post_ra>
